<compile_context>
chip_gen: v7x
topology: tpu7x:2x2x1
jax: 0.10.0
libtpu: 0.0.40
codegen_flags: <defaults>
</compile_context>

<pallas_src>
import functools

import jax
import jax.numpy as jnp
from jax import lax
from jax.experimental import pallas as pl
from jax.experimental.pallas import tpu as pltpu

LANE = 128  # lane-dense output width


def _pg_fused_kernel(x_ref, w1_ref, b1_ref, w2_ref, b2_ref, out_ref, *,
                     action_size):
    # x:  [TB, S]   f32
    # w1: [S, 2H]   bf16   (actor | critic first layers, concatenated)
    # b1: [1, 2H]   f32
    # w2: [2H, 128] bf16   (block-diagonal second layers, zero-padded)
    # b2: [1, 128]  f32
    x = x_ref[...].astype(jnp.bfloat16)

    # Fused first layer for both heads (single MXU issue).
    h = jnp.dot(x, w1_ref[...], preferred_element_type=jnp.float32)
    h = jnp.maximum(h + b1_ref[...], 0.0)                         # [TB, 2H] f32

    # Fused, lane-dense second layer:
    #   z[:, :A]  = actor logits,  z[:, A] = critic value,  z[:, A+1:] = 0
    z = jnp.dot(h.astype(jnp.bfloat16), w2_ref[...],
                preferred_element_type=jnp.float32) + b2_ref[...]  # [TB, 128]

    # Masked, numerically-stable softmax over the first `action_size` lanes.
    col = lax.broadcasted_iota(jnp.int32, z.shape, 1)
    is_logit = col < action_size
    m = jnp.max(jnp.where(is_logit, z, -jnp.inf), axis=-1, keepdims=True)
    e = jnp.where(is_logit, jnp.exp(z - m), 0.0)
    inv_denom = pl.reciprocal(jnp.sum(e, axis=-1, keepdims=True), approx=True)
    probs = e * inv_denom

    # Actor probs in the first A lanes; critic value (and zero pad) pass
    # through z untouched.  Single unmasked 128-wide store.
    out_ref[...] = jnp.where(is_logit, probs, z).astype(out_ref.dtype)


def fuse_params(p):
    """One-time (per parameter update) fusion of the two heads' parameters."""
    H = p["w1a"].shape[1]
    A = p["w2a"].shape[1]
    assert A + 1 <= LANE

    w1 = jnp.concatenate([p["w1a"], p["w1c"]], axis=1).astype(jnp.bfloat16)
    b1 = jnp.concatenate([p["b1a"], p["b1c"]], axis=1).astype(jnp.float32)

    w2 = jnp.zeros((2 * H, LANE), jnp.float32)
    w2 = w2.at[:H, :A].set(p["w2a"])
    w2 = w2.at[H:, A:A + 1].set(p["w2c"])
    w2 = w2.astype(jnp.bfloat16)

    b2 = jnp.zeros((1, LANE), jnp.float32)
    b2 = b2.at[:, :A].set(p["b2a"])
    b2 = b2.at[:, A:A + 1].set(p["b2c"])

    return dict(w1=w1, b1=b1, w2=w2, b2=b2, action_size=A)


@functools.partial(jax.jit, static_argnames=("action_size",))
def policy_gradient_forward(state, w1, b1, w2, b2, *, action_size):
    """state: [B, S] f32. Returns (actor_probs [B, A], critic_value [B, 1])."""
    B, S = state.shape
    H2 = w1.shape[1]

    # Batch tile: single tile at small B; at realistic RL batch sizes this
    # pipelines state/output DMA against compute and (with "parallel"
    # semantics) splits across TensorCores on v7x.
    TB = B
    for cand in (512, 256, 128, 64, 32, 16, 8):
        if B % cand == 0:
            TB = cand
            break
    grid = (B // TB,)

    kernel = functools.partial(_pg_fused_kernel, action_size=action_size)
    out = pl.pallas_call(
        kernel,
        out_shape=jax.ShapeDtypeStruct((B, LANE), jnp.float32),
        grid_spec=pltpu.PrefetchScalarGridSpec(
            num_scalar_prefetch=0,
            grid=grid,
            in_specs=[
                pl.BlockSpec((TB, S), lambda i: (i, 0)),      # state tile
                pl.BlockSpec((S, H2), lambda i: (0, 0)),      # fused W1 (resident)
                pl.BlockSpec((1, H2), lambda i: (0, 0)),      # fused b1
                pl.BlockSpec((H2, LANE), lambda i: (0, 0)),   # fused W2 (resident)
                pl.BlockSpec((1, LANE), lambda i: (0, 0)),    # fused b2
            ],
            out_specs=pl.BlockSpec((TB, LANE), lambda i: (i, 0)),
        ),
        compiler_params=pltpu.CompilerParams(
            dimension_semantics=("parallel",)),
    )(state, w1, b1, w2, b2)

    actor_probs = out[:, :action_size]
    critic_value = out[:, action_size:action_size + 1]
    return actor_probs, critic_value


def init_params(key, state_size, action_size, hidden=256):
    """Mimics PyTorch Linear default init: U(-1/sqrt(fan_in), 1/sqrt(fan_in))."""
    ks = jax.random.split(key, 8)

    def lin(kw, kb, fan_in, fan_out):
        bound = 1.0 / jnp.sqrt(fan_in)
        w = jax.random.uniform(kw, (fan_in, fan_out), jnp.float32, -bound, bound)
        b = jax.random.uniform(kb, (1, fan_out), jnp.float32, -bound, bound)
        return w, b

    w1a, b1a = lin(ks[0], ks[1], state_size, hidden)
    w2a, b2a = lin(ks[2], ks[3], hidden, action_size)
    w1c, b1c = lin(ks[4], ks[5], state_size, hidden)
    w2c, b2c = lin(ks[6], ks[7], hidden, 1)
    return dict(w1a=w1a, b1a=b1a, w2a=w2a, b2a=b2a,
                w1c=w1c, b1c=b1c, w2c=w2c, b2c=b2c)


def _reference_forward(state, p):
    """Pure-JAX f32 reference for correctness checking."""
    h_a = jnp.maximum(state @ p["w1a"] + p["b1a"], 0.0)
    logits = h_a @ p["w2a"] + p["b2a"]
    probs = jax.nn.softmax(logits, axis=-1)
    h_c = jnp.maximum(state @ p["w1c"] + p["b1c"], 0.0)
    value = h_c @ p["w2c"] + p["b2c"]
    return probs, value


if __name__ == "__main__":
    # Small, forward-consistent shapes: batch=8 states of dim 8, 4 actions,
    # hidden layer of 256 (as in the module's __init__).
    B, S, A, H = 8, 8, 4, 256

    key = jax.random.PRNGKey(0)
    k_params, k_state = jax.random.split(key)
    params = init_params(k_params, state_size=S, action_size=A, hidden=H)
    state = jax.random.normal(k_state, (B, S), jnp.float32)

    fused = fuse_params(params)  # done once per parameter update, not per step
    actor_probs, critic_value = policy_gradient_forward(
        state, fused["w1"], fused["b1"], fused["w2"], fused["b2"],
        action_size=fused["action_size"])
    jax.block_until_ready((actor_probs, critic_value))

    ref_probs, ref_value = _reference_forward(state, params)
    assert actor_probs.shape == (B, A) and critic_value.shape == (B, 1)
    # bf16 MXU operands + approx reciprocal -> loosened tolerances vs f32 ref.
    assert jnp.allclose(actor_probs, ref_probs, atol=2e-2, rtol=2e-2)
    assert jnp.allclose(critic_value, ref_value, atol=2e-2, rtol=2e-2)
    assert jnp.allclose(jnp.sum(actor_probs, axis=-1), 1.0, atol=1e-2)

    print("KERNEL_OK")
</pallas_src>

<mosaic_0001>
module attributes {stable_mosaic.version = 11 : i64} {
  func.func @_pg_fused_kernel(%arg0: i32, %arg1: memref<8x8xf32, #tpu.memory_space<vmem>>, %arg2: memref<8x512xbf16, #tpu.memory_space<vmem>>, %arg3: memref<1x512xf32, #tpu.memory_space<vmem>>, %arg4: memref<512x128xbf16, #tpu.memory_space<vmem>>, %arg5: memref<1x128xf32, #tpu.memory_space<vmem>>, %arg6: memref<8x128xf32, #tpu.memory_space<vmem>>) attributes {dimension_semantics = [#tpu.dimension_semantics<parallel>], iteration_bounds = array<i64: 1>, scalar_prefetch = 0 : i64, scratch_operands = 0 : i64, tpu.core_type = #tpu.core_type<tc>, window_params = [{transform_indices = @transform_0, window_bounds = array<i64: 8, 8>}, {pipeline_mode = #tpu.pipeline_mode<synchronous>, transform_indices = @transform_1, window_bounds = array<i64: 8, 512>}, {pipeline_mode = #tpu.pipeline_mode<synchronous>, transform_indices = @transform_2, window_bounds = array<i64: 1, 512>}, {pipeline_mode = #tpu.pipeline_mode<synchronous>, transform_indices = @transform_3, window_bounds = array<i64: 512, 128>}, {pipeline_mode = #tpu.pipeline_mode<synchronous>, transform_indices = @transform_4, window_bounds = array<i64: 1, 128>}, {transform_indices = @transform_5, window_bounds = array<i64: 8, 128>}]} {
    %c0 = arith.constant 0 : index
    %c0_0 = arith.constant 0 : index
    %0 = vector.load %arg1[%c0, %c0_0] : memref<8x8xf32, #tpu.memory_space<vmem>>, vector<8x8xf32>
    %1 = arith.truncf %0 : vector<8x8xf32> to vector<8x8xbf16>
    %c0_1 = arith.constant 0 : index
    %c0_2 = arith.constant 0 : index
    %2 = vector.load %arg2[%c0_1, %c0_2] : memref<8x512xbf16, #tpu.memory_space<vmem>>, vector<8x512xbf16>
    %cst = arith.constant dense<0.000000e+00> : vector<8x512xf32>
    %3 = tpu.matmul %1, %2, %cst {dimension_numbers = #tpu.dot_dimension_numbers<[1], [0], [0], [1], [0, 0, 1, 1], [], []>} : vector<8x8xbf16>, vector<8x512xbf16>, vector<8x512xf32> -> vector<8x512xf32>
    %c0_3 = arith.constant 0 : index
    %c0_4 = arith.constant 0 : index
    %4 = vector.load %arg3[%c0_3, %c0_4] : memref<1x512xf32, #tpu.memory_space<vmem>>, vector<1x512xf32>
    %5 = vector.broadcast %4 : vector<1x512xf32> to vector<8x512xf32>
    %6 = arith.addf %3, %5 : vector<8x512xf32>
    %cst_5 = arith.constant 0.000000e+00 : f32
    %7 = vector.broadcast %cst_5 : f32 to vector<8x512xf32>
    %8 = arith.maximumf %6, %7 : vector<8x512xf32>
    %9 = arith.truncf %8 : vector<8x512xf32> to vector<8x512xbf16>
    %c0_6 = arith.constant 0 : index
    %c0_7 = arith.constant 0 : index
    %10 = vector.load %arg4[%c0_6, %c0_7] : memref<512x128xbf16, #tpu.memory_space<vmem>>, vector<512x128xbf16>
    %cst_8 = arith.constant dense<0.000000e+00> : vector<8x128xf32>
    %11 = tpu.matmul %9, %10, %cst_8 {dimension_numbers = #tpu.dot_dimension_numbers<[1], [0], [0], [1], [0, 0, 1, 1], [], []>} : vector<8x512xbf16>, vector<512x128xbf16>, vector<8x128xf32> -> vector<8x128xf32>
    %c0_9 = arith.constant 0 : index
    %c0_10 = arith.constant 0 : index
    %12 = vector.load %arg5[%c0_9, %c0_10] : memref<1x128xf32, #tpu.memory_space<vmem>>, vector<1x128xf32>
    %13 = vector.broadcast %12 : vector<1x128xf32> to vector<8x128xf32>
    %14 = arith.addf %11, %13 : vector<8x128xf32>
    %15 = tpu.iota {dimensions = array<i32: 1>} : vector<8x128xi32>
    %c4_i32 = arith.constant 4 : i32
    %16 = vector.broadcast %c4_i32 : i32 to vector<8x128xi32>
    %17 = arith.cmpi slt, %15, %16 : vector<8x128xi32>
    %cst_11 = arith.constant 0xFF800000 : f32
    %18 = vector.broadcast %cst_11 : f32 to vector<8x128xf32>
    %19 = arith.select %17, %14, %18 : vector<8x128xi1>, vector<8x128xf32>
    %cst_12 = arith.constant dense<0xFF800000> : vector<8xf32>
    %20 = vector.multi_reduction <maximumf>, %19, %cst_12 [1] : vector<8x128xf32> to vector<8xf32>
    %21 = vector.shape_cast %20 : vector<8xf32> to vector<8x1xf32>
    %22 = vector.broadcast %21 : vector<8x1xf32> to vector<8x128xf32>
    %23 = arith.subf %14, %22 : vector<8x128xf32>
    %24 = math.exp %23 : vector<8x128xf32>
    %cst_13 = arith.constant 0.000000e+00 : f32
    %25 = vector.broadcast %cst_13 : f32 to vector<8x128xf32>
    %26 = arith.select %17, %24, %25 : vector<8x128xi1>, vector<8x128xf32>
    %cst_14 = arith.constant dense<0.000000e+00> : vector<8xf32>
    %27 = vector.multi_reduction <add>, %26, %cst_14 [1] : vector<8x128xf32> to vector<8xf32>
    %28 = vector.shape_cast %27 : vector<8xf32> to vector<8x1xf32>
    %29 = tpu.reciprocal %28 {approx = true} : vector<8x1xf32> -> vector<8x1xf32>
    %30 = vector.broadcast %29 : vector<8x1xf32> to vector<8x128xf32>
    %31 = arith.mulf %26, %30 : vector<8x128xf32>
    %32 = arith.select %17, %31, %14 : vector<8x128xi1>, vector<8x128xf32>
    %c0_15 = arith.constant 0 : index
    %c0_16 = arith.constant 0 : index
    %33 = vector.load %arg6[%c0_15, %c0_16] : memref<8x128xf32, #tpu.memory_space<vmem>>, vector<8x128xf32>
    tpu.vector_store %arg6[%c0_15, %c0_16], %32 {strides = array<i32>} : memref<8x128xf32, #tpu.memory_space<vmem>>, vector<8x128xf32>,
    return
  }
  func.func @transform_0(%arg0: i32) -> (i32, i32) {
    %c0_i32 = arith.constant 0 : i32
    %c0_i32_0 = arith.constant 0 : i32
    return %arg0, %c0_i32 : i32, i32
  }
  func.func @transform_1(%arg0: i32) -> (i32, i32) {
    %c0_i32 = arith.constant 0 : i32
    %c0_i32_0 = arith.constant 0 : i32
    %c0_i32_1 = arith.constant 0 : i32
    return %c0_i32, %c0_i32_0 : i32, i32
  }
  func.func @transform_2(%arg0: i32) -> (i32, i32) {
    %c0_i32 = arith.constant 0 : i32
    %c0_i32_0 = arith.constant 0 : i32
    %c0_i32_1 = arith.constant 0 : i32
    return %c0_i32, %c0_i32_0 : i32, i32
  }
  func.func @transform_3(%arg0: i32) -> (i32, i32) {
    %c0_i32 = arith.constant 0 : i32
    %c0_i32_0 = arith.constant 0 : i32
    %c0_i32_1 = arith.constant 0 : i32
    return %c0_i32, %c0_i32_0 : i32, i32
  }
  func.func @transform_4(%arg0: i32) -> (i32, i32) {
    %c0_i32 = arith.constant 0 : i32
    %c0_i32_0 = arith.constant 0 : i32
    %c0_i32_1 = arith.constant 0 : i32
    return %c0_i32, %c0_i32_0 : i32, i32
  }
  func.func @transform_5(%arg0: i32) -> (i32, i32) {
    %c0_i32 = arith.constant 0 : i32
    %c0_i32_0 = arith.constant 0 : i32
    return %arg0, %c0_i32 : i32, i32
  }
}

</mosaic_0001>

<bundles_post_ra>
// kernel: policy_gradient_forward.1
= control target key start
LH: loop header
LB: loop body
LE: loop exit
PB: predicated region body
PF: predicated region fallthrough
CT: control target
= control target key end

     0   :  { %10 = vsyncpa [#allocation3], 0  ;;  %s848_s0 = inlined_call_operand.hbm [shape: f32[8,8], index: 0, kind: input, shape index: {}]   ;;  %s849_s1 = inlined_call_operand.hbm [shape: bf16[8,512], index: 1, kind: input, shape index: {}]   ;;  %s850_s2 = inlined_call_operand.vmem [shape: f32[1,512], index: 2, kind: input, shape index: {}]   ;;  %s851_s3 = inlined_call_operand.hbm [shape: bf16[512,128], index: 3, kind: input, shape index: {}]   ;;  %s852_s4 = inlined_call_operand.vmem [shape: f32[1,128], index: 4, kind: input, shape index: {}]   ;;  %s853_s5 = inlined_call_operand.vmem [shape: f32[8,128], index: 5, kind: output, shape index: {}]  }
   0x1   :  { %11 = vsyncpa [#allocation5], 0  ;;  %s767_s18 = smov [#allocation4]   ;;  %s768_s20 = smov [#allocation2]  }
   0x2   :  { %s28_s19 = sshll.u32 %s767_s18, 4  ;;  %s18_s21 = sshll.u32 %s768_s20, 4  ;;  %s29_s19 = int_to_ptr.vmem [resolvable:$true] %s28_s19  ;;  %s19_s21 = int_to_ptr.vmem [resolvable:$true] %s18_s21 }
   0x3   :  { %s697_s24 = scalar_lea.hbm %s849_s1, 256 }
   0x4   :  { %p698_p0 = scmp.ne.s32.totalorder %s849_s1, %s697_s24  ;;  %p701_p1 = scmp.lt.u32.totalorder %s697_s24, %s849_s1 }
   0x6   :  { %p703_p2 = pnand %p701_p1, %p698_p0 }
   0x8   :  { %706 = shalt.err (!%p703_p2)
}
   0x9   :  { %s707_s29 = scalar_lea.vmem %s29_s19, 256  ;;  %p712_p4 = scmp.lt.s32.totalorder %s29_s19, %s29_s19 }
   0xa   :  { %p708_p3 = scmp.ne.s32.totalorder %s29_s19, %s707_s29  ;;  %p713_p5 = scmp.lt.s32.totalorder %s707_s29, %s707_s29 }
   0xc   :  { %p714_p6 = por %p713_p5, %p712_p4 }
   0xe   :  { %p715_p7 = pnand %p714_p6, %p708_p3 }
  0x10   :  { %718 = shalt.err (!%p715_p7)
}
  0x11   :  { %31 = dma.hbm_to_vmem [thread:$0]  %s849_s1, 256, %s29_s19, [#allocation5]  }
  0x12   :  { %s719_s9 = scalar_lea.hbm %s848_s0, 128 }
  0x13   :  { %p720_p8 = scmp.ne.s32.totalorder %s848_s0, %s719_s9  ;;  %p723_p9 = scmp.lt.u32.totalorder %s719_s9, %s848_s0 }
  0x15   :  { %p725_p10 = pnand %p723_p9, %p720_p8 }
  0x17   :  { %728 = shalt.err (!%p725_p10)
}
  0x18   :  { %s729_s14 = scalar_lea.vmem %s19_s21, 128  ;;  %p734_p12 = scmp.lt.s32.totalorder %s19_s21, %s19_s21 }
  0x19   :  { %p730_p11 = scmp.ne.s32.totalorder %s19_s21, %s729_s14  ;;  %p735_p13 = scmp.lt.s32.totalorder %s729_s14, %s729_s14 }
  0x1b   :  { %p736_p0 = por %p735_p13, %p734_p12 }
  0x1d   :  { %p737_p1 = pnand %p736_p0, %p730_p11 }
  0x1f   :  { %740 = shalt.err (!%p737_p1)
}
  0x20   :  { %21 = dma.hbm_to_vmem [thread:$0]  %s848_s0, 128, %s19_s21, [#allocation3]  }
  0x21   :  { %s769_s16 = smov [#allocation6]   ;;  %s741_s20 = scalar_lea.hbm %s851_s3, 4096 }
  0x22   :  { %s39_s17 = sshll.u32 %s769_s16, 4  ;;  %p742_p2 = scmp.ne.s32.totalorder %s851_s3, %s741_s20  ;;  %s40_s17 = int_to_ptr.vmem [resolvable:$true] %s39_s17 }
  0x23   :  { %p745_p3 = scmp.lt.u32.totalorder %s741_s20, %s851_s3 }
  0x25   :  { %p747_p4 = pnand %p745_p3, %p742_p2 }
  0x27   :  { %750 = shalt.err (!%p747_p4)
}
  0x28   :  { %s751_s26 = scalar_lea.vmem %s40_s17, 4096  ;;  %p756_p6 = scmp.lt.s32.totalorder %s40_s17, %s40_s17 }
  0x29   :  { %p752_p5 = scmp.ne.s32.totalorder %s40_s17, %s751_s26  ;;  %p757_p7 = scmp.lt.s32.totalorder %s751_s26, %s751_s26 }
  0x2b   :  { %p758_p8 = por %p757_p7, %p756_p6 }
  0x2d   :  { %p759_p9 = pnand %p758_p8, %p752_p5 }
  0x2f   :  { %762 = shalt.err (!%p759_p9)
}
  0x30   :  { %s770_s0 = smov 64   ;;  %s771_s21 = smov 4  }
  0x31   :  { %45 = dma.hbm_to_vmem [thread:$0]  %s851_s3, 4096, %s40_s17, [#allocation5], %s770_s0, %s770_s0, %s771_s21  }
  0x32   :  { %763 = dma.done.wait [#allocation3], 128  }
  0x33   :  { %764 = vsyncadd [#allocation3], 4294967168 }
  0x34   :  { %765 = dma.done.wait [#allocation5], 4352  }
  0x35   :  { %766 = vsyncadd [#allocation5], 4294962944  ;;  %v772_v0 = vmov 0   ;;  %v60_v1 = vld [vmem:[#allocation4] sm:$0xff]  ;;  %vm98_vm0 = vcmask 1043456   ;;  %v61_v2 = vld [vmem:[#allocation4 + $0x8] sm:$0xff]  ;;  %v64_v43 = vlaneseq }
  0x36   :  { %143 = vmatprep.mubr.bf16.mxu0 %v772_v0  ;;  %184 = vmatprep.mubr.bf16.mxu1 %v772_v0  ;;  %v58_v3 = vld [vmem:[#allocation2] sm:$0xff]  ;;  %v567_v4 = vcombine.high %v60_v1, %v60_v1  ;;  %v569_v5 = vcombine.high %v61_v2, %v61_v2  ;;  %v566_v6 = vcombine.low %v60_v1, %v60_v1  ;;  %v661_v8 = vld [vmem:[#allocation6 + $0x40] sm:$0xff]   ;;  %vm94_vm1 = vcmask 64512   ;;  %v669_v19 = vld [vmem:[#allocation6 + $0x50] sm:$0xff]  }
  0x37   :  { %v568_v7 = vcombine.low %v61_v2, %v61_v2  ;;  %v662_v9 = vld [vmem:[#allocation6 + $0xc0] sm:$0xff]   ;;  %v59_v12 = vpack.c.bf16 %v58_v3, %v58_v3  ;;  %v665_v15 = vld [vmem:[#allocation6 + $0x48] sm:$0xff]   ;;  %v670_v20 = vld [vmem:[#allocation6 + $0xd0] sm:$0xff]   ;;  %v65_v44 = vshrl.u32 %v64_v43, 7 }
  0x38   :  { %570 = vmatprep.subr.msk.bf16.mxu0 %vm98_vm0, %v567_v4  ;;  %572 = vmatprep.subr.msk.bf16.mxu1 %vm98_vm0, %v569_v5  ;;  %v100_v10 = vsel %vm98_vm0, %v566_v6, 0  ;;  %v663_v13 = vld [vmem:[#allocation6] sm:$0xff]   ;;  %v666_v16 = vld [vmem:[#allocation6 + $0xc8] sm:$0xff]   ;;  %v671_v21 = vld [vmem:[#allocation6 + $0x10] sm:$0xff]  }
  0x39   :  { %v106_v11 = vsel %vm98_vm0, %v568_v7, 0  ;;  %112 = vmatpush1.bf16.msra.mxu0 %v100_v10  ;;  %v664_v14 = vld [vmem:[#allocation6 + $0x80] sm:$0xff]   ;;  %v667_v17 = vld [vmem:[#allocation6 + $0x8] sm:$0xff]   ;;  %v672_v22 = vld [vmem:[#allocation6 + $0x90] sm:$0xff]   ;;  %v66_v45 = vsub.s32 0, %v65_v44  ;;  %v74_v46 = vsub.s32 2, %v65_v44 }
  0x3a   :  { %153 = vmatpush1.bf16.msra.mxu1 %v106_v11  ;;  %607 = vmatprep.subr.bf16.mxu0 %v661_v8  ;;  %v668_v18 = vld [vmem:[#allocation6 + $0x88] sm:$0xff]   ;;  %v673_v23 = vld [vmem:[#allocation6 + $0x58] sm:$0xff]   ;;  %v677_v27 = vld [vmem:[#allocation6 + $0x60] sm:$0xff]   ;;  %v70_v48 = vsub.s32 1, %v65_v44  ;;  %v78_v49 = vsub.s32 3, %v65_v44 }
  0x3b   :  { %629 = vmatprep.subr.bf16.mxu1 %v662_v9  ;;  %v674_v24 = vld [vmem:[#allocation6 + $0xd8] sm:$0xff]   ;;  %v678_v28 = vld [vmem:[#allocation6 + $0xe0] sm:$0xff]   ;;  %v681_v31 = vld [vmem:[#allocation6 + $0x68] sm:$0xff]  }
  0x3c   :  { %571 = vmatmul.mubr.msk.bf16.vlgmr.msra.gmra.mrb[0].mxu0 %vm94_vm1, %v59_v12  ;;  %v675_v25 = vld [vmem:[#allocation6 + $0x18] sm:$0xff]   ;;  %v679_v29 = vld [vmem:[#allocation6 + $0x20] sm:$0xff]   ;;  %v682_v32 = vld [vmem:[#allocation6 + $0xe8] sm:$0xff]  }
  0x3d   :  { %573 = vmatmul.mubr.msk.bf16.vlgmr.msra.gmra.mrb[0].mxu1 %vm94_vm1, %v59_v12  ;;  %608 = vmatpush3.bf16.msra.mxu0 %v663_v13  ;;  %v676_v26 = vld [vmem:[#allocation6 + $0x98] sm:$0xff]   ;;  %v680_v30 = vld [vmem:[#allocation6 + $0xa0] sm:$0xff]   ;;  %v683_v33 = vld [vmem:[#allocation6 + $0x28] sm:$0xff]  }
  0x3e   :  { %630 = vmatpush3.bf16.msra.mxu1 %v664_v14  ;;  %609 = vmatprep.subr.bf16.mxu0 %v665_v15  ;;  %v684_v34 = vld [vmem:[#allocation6 + $0xa8] sm:$0xff]   ;;  %v685_v35 = vld [vmem:[#allocation6 + $0x70] sm:$0xff]   ;;  %v689_v39 = vld [vmem:[#allocation6 + $0x78] sm:$0xff]   ;;  %v545_v15 = vand.u32 127, %v64_v43 }
  0x3f   :  { %631 = vmatprep.subr.bf16.mxu1 %v666_v16  ;;  %v686_v36 = vld [vmem:[#allocation6 + $0xf0] sm:$0xff]   ;;  %v690_v40 = vld [vmem:[#allocation6 + $0xf8] sm:$0xff]   ;;  %v62_v47 = vld [vmem:[%s850_s2] sm:$0xf] }
  0x40   :  { %v687_v37 = vld [vmem:[#allocation6 + $0x30] sm:$0xff]   ;;  %v691_v41 = vld [vmem:[#allocation6 + $0x38] sm:$0xff]   ;;  %v67_v50 = vrot.slane %v62_v47, %v66_v45  ;;  %v75_v51 = vrot.slane %v62_v47, %v74_v46  ;;  %v71_v52 = vrot.slane %v62_v47, %v70_v48  ;;  %v79_v53 = vrot.slane %v62_v47, %v78_v49  ;;  %v574_v12 = vld [vmem:[%s852_s4] ss:$0 sm:$0xff] }
  0x41   :  { %610 = vmatpush3.bf16.msra.mxu0 %v667_v17  ;;  %v688_v38 = vld [vmem:[#allocation6 + $0xb0] sm:$0xff]   ;;  %v692_v42 = vld [vmem:[#allocation6 + $0xb8] sm:$0xff]   ;;  %vm546_vm2 = vcmp.lt.s32.totalorder %v545_v15, 4 }
  0x42   :  { %632 = vmatpush3.bf16.msra.mxu1 %v668_v18  ;;  %611 = vmatprep.subr.bf16.mxu0 %v669_v19 }
  0x43   :  { %633 = vmatprep.subr.bf16.mxu1 %v670_v20 }
  0x45   :  { %612 = vmatpush3.bf16.msra.mxu0 %v671_v21 }
  0x46   :  { %634 = vmatpush3.bf16.msra.mxu1 %v672_v22  ;;  %613 = vmatprep.subr.bf16.mxu0 %v673_v23 }
  0x47   :  { %635 = vmatprep.subr.bf16.mxu1 %v674_v24 }
  0x49   :  { %614 = vmatpush3.bf16.msra.mxu0 %v675_v25 }
  0x4a   :  { %636 = vmatpush3.bf16.msra.mxu1 %v676_v26  ;;  %615 = vmatprep.subr.bf16.mxu0 %v677_v27 }
  0x4b   :  { %637 = vmatprep.subr.bf16.mxu1 %v678_v28 }
  0x4d   :  { %616 = vmatpush3.bf16.msra.mxu0 %v679_v29 }
  0x4e   :  { %638 = vmatpush3.bf16.msra.mxu1 %v680_v30  ;;  %617 = vmatprep.subr.bf16.mxu0 %v681_v31 }
  0x4f   :  { %639 = vmatprep.subr.bf16.mxu1 %v682_v32 }
  0x51   :  { %618 = vmatpush3.bf16.msra.mxu0 %v683_v33 }
  0x52   :  { %640 = vmatpush3.bf16.msra.mxu1 %v684_v34  ;;  %619 = vmatprep.subr.bf16.mxu0 %v685_v35 }
  0x53   :  { %641 = vmatprep.subr.bf16.mxu1 %v686_v36 }
  0x55   :  { %620 = vmatpush3.bf16.msra.mxu0 %v687_v37 }
  0x56   :  { %642 = vmatpush3.bf16.msra.mxu1 %v688_v38  ;;  %621 = vmatprep.subr.bf16.mxu0 %v689_v39 }
  0x57   :  { %643 = vmatprep.subr.bf16.mxu1 %v690_v40 }
  0x59   :  { %622 = vmatpush3.bf16.msra.mxu0 %v691_v41 }
  0x5a   :  { %644 = vmatpush3.bf16.msra.mxu1 %v692_v42 }
 0x10f   :  { %v145_v54 = vpop.f32.mrb[0].mxu0 }
 0x110   :  { %v186_v55 = vpop.f32.mrb[0].mxu1  ;;  %v146_v56 = vadd.f32 %v145_v54, %v67_v50  ;;  %v147_v58 = vpop.f32.mrb[1].mxu0 }
 0x111   :  { %v187_v57 = vadd.f32 %v186_v55, %v75_v51  ;;  %v188_v59 = vpop.f32.mrb[1].mxu1  ;;  %v148_v60 = vadd.f32 %v147_v58, %v71_v52  ;;  %v149_v62 = vpop.f32.mrb[2].mxu0 }
 0x112   :  { %v189_v61 = vadd.f32 %v188_v59, %v79_v53  ;;  %v190_v63 = vpop.f32.mrb[2].mxu1  ;;  %v193_v0 = vmax.f32 %v146_v56, 0.0  ;;  %v150_v2 = vpop.f32.mrb[3].mxu0 }
 0x113   :  { %v195_v1 = vmax.f32 %v187_v57, 0.0  ;;  %v191_v3 = vpop.f32.mrb[3].mxu1  ;;  %v194_v4 = vmax.f32 %v148_v60, 0.0 }
 0x114   :  { %v196_v5 = vmax.f32 %v189_v61, 0.0  ;;  %v197_v9 = vpack.c.bf16 %v193_v0, %v193_v0 }
 0x115   :  { %v199_v6 = vpack.c.bf16 %v195_v1, %v195_v1  ;;  %v198_v7 = vpack.c.bf16 %v194_v4, %v194_v4 }
 0x116   :  { %v200_v8 = vpack.c.bf16 %v196_v5, %v196_v5 }
 0x117   :  { %496 = vmatprep.mubr.bf16.mxu0 %v198_v7 }
 0x118   :  { %536 = vmatprep.mubr.bf16.mxu1 %v200_v8  ;;  %497 = vmatmul.mubr.bf16.vlgmr.msra.gmra.mrb[4].mxu0 %v197_v9 }
 0x119   :  { %537 = vmatmul.mubr.bf16.vlgmr.msra.gmra.mrb[4].mxu1 %v199_v6 }
 0x1eb   :  { %v623_v10 = vpop.f32.mrb[4].mxu0 }
 0x1ec   :  { %v645_v11 = vpop.f32.mrb[4].mxu1  ;;  %v624_v13 = vpop.f32.mrb[5].mxu0 }
 0x1ed   :  { %v646_v14 = vpop.f32.mrb[5].mxu1  ;;  %v625_v16 = vadd.f32 %v624_v13, %v623_v10  ;;  %v626_v18 = vpop.f32.mrb[6].mxu0 }
 0x1ee   :  { %v647_v17 = vadd.f32 %v646_v14, %v645_v11  ;;  %v648_v19 = vpop.f32.mrb[6].mxu1  ;;  %v627_v20 = vpop.f32.mrb[7].mxu0 }
 0x1ef   :  { %v649_v21 = vpop.f32.mrb[7].mxu1  ;;  %v499_v22 = vadd.f32 %v625_v16, %v574_v12 }
 0x1f1   :  { %v539_v23 = vadd.f32 %v647_v17, %v499_v22 }
 0x1f3   :  { %v547_v24 = vsel %vm546_vm2, %v539_v23, -inf }
 0x1f4   :  { %548 = vmax.xlane.f32.xlu0 %v547_v24 }
 0x281   :  { %v549_v25 = vpop.xlane.xlu0 %548 }
 0x282   :  { %v550_v26 = vsub.f32 %v539_v23, %v549_v25 }
 0x284   :  { %v551_v27 = vmul.f32 1.442695, %v550_v26 }
 0x286   :  { %693 = vpow2.f32 %v551_v27 }
 0x290   :  { %v694_v28 = vpop.eup %693 }
 0x291   :  { %v553_v29 = vsel %vm546_vm2, %v694_v28, 0.0 }
 0x292   :  { %554 = vadd.xlane.f32.xlu0 %v553_v29 }
 0x31f   :  { %v555_v30 = vpop.xlane.xlu0 %554 }
 0x320   :  { %695 = vrcp.f32 %v555_v30 }
 0x32a   :  { %v696_v31 = vpop.eup %695 }
 0x32b   :  { %v557_v32 = vmul.f32 %v696_v31, %v553_v29 }
 0x32d   :  { %v558_v33 = vsel %vm546_vm2, %v557_v32, %v539_v23 }
 0x32e   :  { %559 = vst [vmem:[%s853_s5] sm:$0xff] %v558_v33 }
 0x32f   :  { %564 = vsyncpa [#allocation3], 1 }
 0x330   :  { %565 = vsyncpa [#allocation5], 1 }

</bundles_post_ra>
